<compile_context>
chip_gen: v5e
topology: v5e:2x2
jax: 0.10.0
libtpu: 0.0.40
codegen_flags: <defaults>
</compile_context>

<pallas_src>
import functools

import jax
import jax.numpy as jnp
import numpy as np
from jax import lax
from jax.experimental import pallas as pl
from jax.experimental.pallas import tpu as pltpu


# ----------------------------------------------------------------------------
# BN folding helper
# ----------------------------------------------------------------------------
def _fold_bn(gamma, beta, mean, var, eps=1e-5):
    scale = gamma / jnp.sqrt(var + eps)
    bias = beta - mean * scale
    return scale, bias          # both (cout,)


# ----------------------------------------------------------------------------
# Fused NormalBlock kernel: one batch element per grid step.
# ----------------------------------------------------------------------------
def _normal_block_kernel(*refs, k, stride, pad, H, W, Ho, Wo, has_proj):
    if has_proj:
        (x_ref, w1_ref, b1_ref, w2_ref, b2_ref, wr_ref,
         out_ref, xpad_buf, out1_buf) = refs
    else:
        (x_ref, w1_ref, b1_ref, w2_ref, b2_ref,
         out_ref, xpad_buf, out1_buf) = refs
        wr_ref = None

    f32 = jnp.float32
    cout = out_ref.shape[-1]

    # ---- stage 0: spatial zero-padding entirely inside VMEM (no HBM copy) ----
    xpad_buf[...] = jnp.zeros_like(xpad_buf)
    xpad_buf[pl.ds(pad, H), pl.ds(pad, W), :] = x_ref[...]
    out1_buf[...] = jnp.zeros_like(out1_buf)        # zero halo for conv2

    def wslice(start):
        # Output-width window starting at `start`; strided for conv1/residual.
        if stride == 1:
            return pl.ds(start, Wo)
        return pl.ds(start, Wo, stride=stride)

    # Loop-invariant bias rows seed the accumulators (BN folded outside).
    bias1 = jnp.broadcast_to(b1_ref[...], (Wo, cout)).astype(f32)
    bias2 = jnp.broadcast_to(b2_ref[...], (Wo, cout)).astype(f32)

    # ---- stage 1: conv1 (k x k, stride) + BN + ReLU, one output row per iter ----
    def conv1_row(ho, carry):
        acc = bias1
        for i in range(k):
            for j in range(k):
                x_tap = xpad_buf[ho * stride + i, wslice(j), :]      # (Wo, cin) f32
                acc = acc + jnp.dot(x_tap.astype(jnp.bfloat16),
                                    w1_ref[i * k + j],
                                    preferred_element_type=f32)
        out1_buf[ho + pad, pl.ds(pad, Wo), :] = (
            jnp.maximum(acc, 0.0).astype(out1_buf.dtype))
        return carry

    lax.fori_loop(0, Ho, conv1_row, 0)

    # ---- stage 2: conv2 (k x k, stride 1) + BN + residual + final ReLU ----
    def conv2_row(ho, carry):
        acc = bias2
        for i in range(k):
            for j in range(k):
                t = out1_buf[ho + i, pl.ds(j, Wo), :]                # (Wo, cout) bf16
                acc = acc + jnp.dot(t, w2_ref[i * k + j],
                                    preferred_element_type=f32)
        r = xpad_buf[pad + ho * stride, wslice(pad), :]              # (Wo, cin) f32
        if has_proj:
            acc = acc + jnp.dot(r.astype(jnp.bfloat16), wr_ref[...],
                                preferred_element_type=f32)
        else:
            acc = acc + r                                            # identity, f32
        out_ref[ho] = jnp.maximum(acc, 0.0).astype(out_ref.dtype)
        return carry

    lax.fori_loop(0, Ho, conv2_row, 0)


# ----------------------------------------------------------------------------
# NormalBlock forward (NCHW in / NCHW out)
# ----------------------------------------------------------------------------
def normal_block_forward(x_nchw, params, kernel_size, stride):
    k = kernel_size
    pad = k // 2
    x = jnp.transpose(x_nchw, (0, 2, 3, 1)).astype(jnp.float32)      # NHWC, f32
    B, H, W, cin = x.shape
    cout = params["w1"].shape[0]
    Ho = (H + 2 * pad - k) // stride + 1
    Wo = (W + 2 * pad - k) // stride + 1
    Hp, Wp = H + 2 * pad, W + 2 * pad

    has_proj = params.get("w_res") is not None
    if not has_proj:
        assert stride == 1 and cin == cout, (
            "identity residual requires stride == 1 and cin == cout")

    s1, b1 = _fold_bn(params["g1"], params["be1"], params["m1"], params["v1"])
    s2, b2 = _fold_bn(params["g2"], params["be2"], params["m2"], params["v2"])

    # (cout, cin, kh, kw) -> (kh*kw, cin, cout) with the BN scale folded in.
    w1 = (jnp.transpose(params["w1"], (2, 3, 1, 0)).reshape(k * k, cin, cout)
          * s1.reshape(1, 1, cout)).astype(jnp.bfloat16)
    w2 = (jnp.transpose(params["w2"], (2, 3, 1, 0)).reshape(k * k, cout, cout)
          * s2.reshape(1, 1, cout)).astype(jnp.bfloat16)
    b1 = b1.reshape(1, cout).astype(jnp.float32)
    b2 = b2.reshape(1, cout).astype(jnp.float32)

    inputs = [x, w1, b1, w2, b2]
    in_specs = [
        pl.BlockSpec((None, H, W, cin), lambda b: (b, 0, 0, 0)),
        pl.BlockSpec((k * k, cin, cout), lambda b: (0, 0, 0)),
        pl.BlockSpec((1, cout), lambda b: (0, 0)),
        pl.BlockSpec((k * k, cout, cout), lambda b: (0, 0, 0)),
        pl.BlockSpec((1, cout), lambda b: (0, 0)),
    ]
    if has_proj:
        wr = jnp.transpose(params["w_res"], (2, 3, 1, 0)).reshape(cin, cout)
        inputs.append(wr.astype(jnp.bfloat16))
        in_specs.append(pl.BlockSpec((cin, cout), lambda b: (0, 0)))

    kernel = functools.partial(
        _normal_block_kernel, k=k, stride=stride, pad=pad,
        H=H, W=W, Ho=Ho, Wo=Wo, has_proj=has_proj)

    out_nhwc = pl.pallas_call(
        kernel,
        out_shape=jax.ShapeDtypeStruct((B, Ho, Wo, cout), jnp.float32),
        grid_spec=pltpu.PrefetchScalarGridSpec(
            num_scalar_prefetch=0,
            grid=(B,),
            in_specs=in_specs,
            out_specs=pl.BlockSpec((None, Ho, Wo, cout),
                                   lambda b: (b, 0, 0, 0)),
            scratch_shapes=[
                pltpu.VMEM((Hp, Wp, cin), jnp.float32),                 # padded x
                pltpu.VMEM((Ho + 2 * pad, Wo + 2 * pad, cout),
                           jnp.bfloat16),                               # conv1 out
            ],
        ),
        compiler_params=pltpu.CompilerParams(
            dimension_semantics=("parallel",)),
    )(*inputs)
    return jnp.transpose(out_nhwc, (0, 3, 1, 2))                        # back to NCHW


# ----------------------------------------------------------------------------
# Pure-JAX f32 reference (lax.conv) for the correctness check
# ----------------------------------------------------------------------------
def _conv_ref(x_nhwc, w_oihw, stride, pad):
    return jax.lax.conv_general_dilated(
        x_nhwc, jnp.transpose(w_oihw, (2, 3, 1, 0)),
        window_strides=(stride, stride),
        padding=((pad, pad), (pad, pad)),
        dimension_numbers=("NHWC", "HWIO", "NHWC"))


def normal_block_ref(x_nchw, params, kernel_size, stride):
    k = kernel_size
    pad = k // 2
    x = jnp.transpose(x_nchw, (0, 2, 3, 1)).astype(jnp.float32)
    s1, b1 = _fold_bn(params["g1"], params["be1"], params["m1"], params["v1"])
    s2, b2 = _fold_bn(params["g2"], params["be2"], params["m2"], params["v2"])
    out = _conv_ref(x, params["w1"], stride, pad) * s1 + b1
    out = jnp.maximum(out, 0.0)
    out = _conv_ref(out, params["w2"], 1, pad) * s2 + b2
    if params.get("w_res") is not None:
        res = _conv_ref(x, params["w_res"], stride, 0)
    else:
        res = x
    out = jnp.maximum(out + res, 0.0)
    return jnp.transpose(out, (0, 3, 1, 2))


# ----------------------------------------------------------------------------
def _make_params(key, cin, cout, k, with_proj):
    keys = jax.random.split(key, 12)
    p = {
        "w1": jax.random.normal(keys[0], (cout, cin, k, k), jnp.float32) * 0.1,
        "w2": jax.random.normal(keys[1], (cout, cout, k, k), jnp.float32) * 0.1,
        "w_res": (jax.random.normal(keys[2], (cout, cin, 1, 1), jnp.float32) * 0.1
                  if with_proj else None),
        "g1": 0.5 + jax.random.uniform(keys[3], (cout,), jnp.float32),
        "be1": jax.random.normal(keys[4], (cout,), jnp.float32) * 0.1,
        "m1": jax.random.normal(keys[5], (cout,), jnp.float32) * 0.1,
        "v1": 0.5 + jax.random.uniform(keys[6], (cout,), jnp.float32),
        "g2": 0.5 + jax.random.uniform(keys[7], (cout,), jnp.float32),
        "be2": jax.random.normal(keys[8], (cout,), jnp.float32) * 0.1,
        "m2": jax.random.normal(keys[9], (cout,), jnp.float32) * 0.1,
        "v2": 0.5 + jax.random.uniform(keys[10], (cout,), jnp.float32),
    }
    return p, keys[11]


if __name__ == "__main__":
    key = jax.random.PRNGKey(0)
    K = 3
    fwd = jax.jit(normal_block_forward, static_argnums=(2, 3))

    # Config A: stride=2, cin != cout -> 1x1 projection residual.
    B, Cin, Cout, H, W, STRIDE = 2, 4, 8, 16, 16, 2
    key_a, key_b = jax.random.split(key)
    params_a, xkey_a = _make_params(key_a, Cin, Cout, K, with_proj=True)
    x_a = jax.random.normal(xkey_a, (B, Cin, H, W), jnp.float32)

    out_a = jax.block_until_ready(fwd(x_a, params_a, K, STRIDE))
    ref_a = jax.block_until_ready(normal_block_ref(x_a, params_a, K, STRIDE))
    assert out_a.shape == (B, Cout, H // STRIDE, W // STRIDE), out_a.shape
    np.testing.assert_allclose(np.asarray(out_a), np.asarray(ref_a),
                               rtol=5e-2, atol=5e-2)

    # Config B: stride=1, cin == cout -> identity residual.
    Cin2 = Cout2 = 8
    params_b, xkey_b = _make_params(key_b, Cin2, Cout2, K, with_proj=False)
    x_b = jax.random.normal(xkey_b, (B, Cin2, H, W), jnp.float32)

    out_b = jax.block_until_ready(fwd(x_b, params_b, K, 1))
    ref_b = jax.block_until_ready(normal_block_ref(x_b, params_b, K, 1))
    assert out_b.shape == (B, Cout2, H, W), out_b.shape
    np.testing.assert_allclose(np.asarray(out_b), np.asarray(ref_b),
                               rtol=5e-2, atol=5e-2)

    print("KERNEL_OK")
</pallas_src>

<mosaic_0001>
module attributes {stable_mosaic.version = 11 : i64} {
  func.func @_normal_block_kernel(%arg0: i32, %arg1: memref<1x16x16x4xf32, #tpu.memory_space<vmem>>, %arg2: memref<9x4x8xbf16, #tpu.memory_space<vmem>>, %arg3: memref<1x8xf32, #tpu.memory_space<vmem>>, %arg4: memref<9x8x8xbf16, #tpu.memory_space<vmem>>, %arg5: memref<1x8xf32, #tpu.memory_space<vmem>>, %arg6: memref<4x8xbf16, #tpu.memory_space<vmem>>, %arg7: memref<1x8x8x8xf32, #tpu.memory_space<vmem>>, %arg8: memref<18x18x4xf32, #tpu.memory_space<vmem>>, %arg9: memref<10x10x8xbf16, #tpu.memory_space<vmem>>) attributes {dimension_semantics = [#tpu.dimension_semantics<parallel>], iteration_bounds = array<i64: 2>, scalar_prefetch = 0 : i64, scratch_operands = 2 : i64, tpu.core_type = #tpu.core_type<tc>, window_params = [{transform_indices = @transform_0, window_bounds = array<i64: 1, 16, 16, 4>}, {pipeline_mode = #tpu.pipeline_mode<synchronous>, transform_indices = @transform_1, window_bounds = array<i64: 9, 4, 8>}, {pipeline_mode = #tpu.pipeline_mode<synchronous>, transform_indices = @transform_2, window_bounds = array<i64: 1, 8>}, {pipeline_mode = #tpu.pipeline_mode<synchronous>, transform_indices = @transform_3, window_bounds = array<i64: 9, 8, 8>}, {pipeline_mode = #tpu.pipeline_mode<synchronous>, transform_indices = @transform_4, window_bounds = array<i64: 1, 8>}, {pipeline_mode = #tpu.pipeline_mode<synchronous>, transform_indices = @transform_5, window_bounds = array<i64: 4, 8>}, {transform_indices = @transform_6, window_bounds = array<i64: 1, 8, 8, 8>}]} {
    %cst = arith.constant 0.000000e+00 : f32
    %0 = vector.broadcast %cst : f32 to vector<18x18x4xf32>
    %c0 = arith.constant 0 : index
    %c0_0 = arith.constant 0 : index
    %c0_1 = arith.constant 0 : index
    %1 = vector.load %arg8[%c0, %c0_0, %c0_1] : memref<18x18x4xf32, #tpu.memory_space<vmem>>, vector<18x18x4xf32>
    tpu.vector_store %arg8[%c0, %c0_0, %c0_1], %0 {strides = array<i32>} : memref<18x18x4xf32, #tpu.memory_space<vmem>>, vector<18x18x4xf32>,
    %c0_2 = arith.constant 0 : index
    %c0_3 = arith.constant 0 : index
    %c0_4 = arith.constant 0 : index
    %c0_5 = arith.constant 0 : index
    %2 = vector.load %arg1[%c0_2, %c0_3, %c0_4, %c0_5] : memref<1x16x16x4xf32, #tpu.memory_space<vmem>>, vector<1x16x16x4xf32>
    %3 = vector.shape_cast %2 : vector<1x16x16x4xf32> to vector<16x16x4xf32>
    %c1 = arith.constant 1 : index
    %c1_6 = arith.constant 1 : index
    %c0_7 = arith.constant 0 : index
    %4 = vector.load %arg8[%c1, %c1_6, %c0_7] : memref<18x18x4xf32, #tpu.memory_space<vmem>>, vector<16x16x4xf32>
    tpu.vector_store %arg8[%c1, %c1_6, %c0_7], %3 {strides = array<i32>} : memref<18x18x4xf32, #tpu.memory_space<vmem>>, vector<16x16x4xf32>,
    %cst_8 = arith.constant 0.000000e+00 : bf16
    %5 = vector.broadcast %cst_8 : bf16 to vector<10x10x8xbf16>
    %c0_9 = arith.constant 0 : index
    %c0_10 = arith.constant 0 : index
    %c0_11 = arith.constant 0 : index
    %6 = vector.load %arg9[%c0_9, %c0_10, %c0_11] : memref<10x10x8xbf16, #tpu.memory_space<vmem>>, vector<10x10x8xbf16>
    tpu.vector_store %arg9[%c0_9, %c0_10, %c0_11], %5 {strides = array<i32>} : memref<10x10x8xbf16, #tpu.memory_space<vmem>>, vector<10x10x8xbf16>,
    %c0_12 = arith.constant 0 : index
    %c0_13 = arith.constant 0 : index
    %7 = vector.load %arg3[%c0_12, %c0_13] : memref<1x8xf32, #tpu.memory_space<vmem>>, vector<1x8xf32>
    %8 = vector.shape_cast %7 : vector<1x8xf32> to vector<1x8xf32>
    %9 = vector.broadcast %8 : vector<1x8xf32> to vector<8x8xf32>
    %c0_14 = arith.constant 0 : index
    %c0_15 = arith.constant 0 : index
    %10 = vector.load %arg5[%c0_14, %c0_15] : memref<1x8xf32, #tpu.memory_space<vmem>>, vector<1x8xf32>
    %11 = vector.shape_cast %10 : vector<1x8xf32> to vector<1x8xf32>
    %12 = vector.broadcast %11 : vector<1x8xf32> to vector<8x8xf32>
    %c0_i32 = arith.constant 0 : i32
    %c8_i32 = arith.constant 8 : i32
    %13 = arith.addi %c0_i32, %c8_i32 : i32
    %c1_i32 = arith.constant 1 : i32
    scf.for %arg10 = %c0_i32 to %13 step %c1_i32  : i32 {
      %c2_i32 = arith.constant 2 : i32
      %15 = arith.muli %arg10, %c2_i32 : i32
      %c0_i32_21 = arith.constant 0 : i32
      %16 = arith.addi %15, %c0_i32_21 : i32
      %17 = arith.index_cast %16 : i32 to index
      %c0_22 = arith.constant 0 : index
      %c0_23 = arith.constant 0 : index
      %18 = tpu.strided_load %arg8[%17, %c0_22, %c0_23] {strides = array<i32: 1, 2, 1>} : memref<18x18x4xf32, #tpu.memory_space<vmem>>, vector<1x8x4xf32>
      %19 = vector.shape_cast %18 : vector<1x8x4xf32> to vector<8x4xf32>
      %20 = arith.truncf %19 : vector<8x4xf32> to vector<8x4xbf16>
      %c0_24 = arith.constant 0 : index
      %c0_25 = arith.constant 0 : index
      %c0_26 = arith.constant 0 : index
      %21 = vector.load %arg2[%c0_24, %c0_25, %c0_26] : memref<9x4x8xbf16, #tpu.memory_space<vmem>>, vector<1x4x8xbf16>
      %22 = vector.shape_cast %21 : vector<1x4x8xbf16> to vector<4x8xbf16>
      %cst_27 = arith.constant dense<0.000000e+00> : vector<8x8xf32>
      %23 = tpu.matmul %20, %22, %cst_27 {dimension_numbers = #tpu.dot_dimension_numbers<[1], [0], [0], [1], [0, 0, 1, 1], [], []>} : vector<8x4xbf16>, vector<4x8xbf16>, vector<8x8xf32> -> vector<8x8xf32>
      %24 = arith.addf %9, %23 : vector<8x8xf32>
      %c2_i32_28 = arith.constant 2 : i32
      %25 = arith.muli %arg10, %c2_i32_28 : i32
      %c0_i32_29 = arith.constant 0 : i32
      %26 = arith.addi %25, %c0_i32_29 : i32
      %27 = arith.index_cast %26 : i32 to index
      %c1_30 = arith.constant 1 : index
      %c0_31 = arith.constant 0 : index
      %28 = tpu.strided_load %arg8[%27, %c1_30, %c0_31] {strides = array<i32: 1, 2, 1>} : memref<18x18x4xf32, #tpu.memory_space<vmem>>, vector<1x8x4xf32>
      %29 = vector.shape_cast %28 : vector<1x8x4xf32> to vector<8x4xf32>
      %30 = arith.truncf %29 : vector<8x4xf32> to vector<8x4xbf16>
      %c1_32 = arith.constant 1 : index
      %c0_33 = arith.constant 0 : index
      %c0_34 = arith.constant 0 : index
      %31 = vector.load %arg2[%c1_32, %c0_33, %c0_34] : memref<9x4x8xbf16, #tpu.memory_space<vmem>>, vector<1x4x8xbf16>
      %32 = vector.shape_cast %31 : vector<1x4x8xbf16> to vector<4x8xbf16>
      %cst_35 = arith.constant dense<0.000000e+00> : vector<8x8xf32>
      %33 = tpu.matmul %30, %32, %cst_35 {dimension_numbers = #tpu.dot_dimension_numbers<[1], [0], [0], [1], [0, 0, 1, 1], [], []>} : vector<8x4xbf16>, vector<4x8xbf16>, vector<8x8xf32> -> vector<8x8xf32>
      %34 = arith.addf %24, %33 : vector<8x8xf32>
      %c2_i32_36 = arith.constant 2 : i32
      %35 = arith.muli %arg10, %c2_i32_36 : i32
      %c0_i32_37 = arith.constant 0 : i32
      %36 = arith.addi %35, %c0_i32_37 : i32
      %37 = arith.index_cast %36 : i32 to index
      %c2 = arith.constant 2 : index
      %c0_38 = arith.constant 0 : index
      %38 = tpu.strided_load %arg8[%37, %c2, %c0_38] {strides = array<i32: 1, 2, 1>} : memref<18x18x4xf32, #tpu.memory_space<vmem>>, vector<1x8x4xf32>
      %39 = vector.shape_cast %38 : vector<1x8x4xf32> to vector<8x4xf32>
      %40 = arith.truncf %39 : vector<8x4xf32> to vector<8x4xbf16>
      %c2_39 = arith.constant 2 : index
      %c0_40 = arith.constant 0 : index
      %c0_41 = arith.constant 0 : index
      %41 = vector.load %arg2[%c2_39, %c0_40, %c0_41] : memref<9x4x8xbf16, #tpu.memory_space<vmem>>, vector<1x4x8xbf16>
      %42 = vector.shape_cast %41 : vector<1x4x8xbf16> to vector<4x8xbf16>
      %cst_42 = arith.constant dense<0.000000e+00> : vector<8x8xf32>
      %43 = tpu.matmul %40, %42, %cst_42 {dimension_numbers = #tpu.dot_dimension_numbers<[1], [0], [0], [1], [0, 0, 1, 1], [], []>} : vector<8x4xbf16>, vector<4x8xbf16>, vector<8x8xf32> -> vector<8x8xf32>
      %44 = arith.addf %34, %43 : vector<8x8xf32>
      %c2_i32_43 = arith.constant 2 : i32
      %45 = arith.muli %arg10, %c2_i32_43 : i32
      %c1_i32_44 = arith.constant 1 : i32
      %46 = arith.addi %45, %c1_i32_44 : i32
      %47 = arith.index_cast %46 : i32 to index
      %c0_45 = arith.constant 0 : index
      %c0_46 = arith.constant 0 : index
      %48 = tpu.strided_load %arg8[%47, %c0_45, %c0_46] {strides = array<i32: 1, 2, 1>} : memref<18x18x4xf32, #tpu.memory_space<vmem>>, vector<1x8x4xf32>
      %49 = vector.shape_cast %48 : vector<1x8x4xf32> to vector<8x4xf32>
      %50 = arith.truncf %49 : vector<8x4xf32> to vector<8x4xbf16>
      %c3 = arith.constant 3 : index
      %c0_47 = arith.constant 0 : index
      %c0_48 = arith.constant 0 : index
      %51 = vector.load %arg2[%c3, %c0_47, %c0_48] : memref<9x4x8xbf16, #tpu.memory_space<vmem>>, vector<1x4x8xbf16>
      %52 = vector.shape_cast %51 : vector<1x4x8xbf16> to vector<4x8xbf16>
      %cst_49 = arith.constant dense<0.000000e+00> : vector<8x8xf32>
      %53 = tpu.matmul %50, %52, %cst_49 {dimension_numbers = #tpu.dot_dimension_numbers<[1], [0], [0], [1], [0, 0, 1, 1], [], []>} : vector<8x4xbf16>, vector<4x8xbf16>, vector<8x8xf32> -> vector<8x8xf32>
      %54 = arith.addf %44, %53 : vector<8x8xf32>
      %c2_i32_50 = arith.constant 2 : i32
      %55 = arith.muli %arg10, %c2_i32_50 : i32
      %c1_i32_51 = arith.constant 1 : i32
      %56 = arith.addi %55, %c1_i32_51 : i32
      %57 = arith.index_cast %56 : i32 to index
      %c1_52 = arith.constant 1 : index
      %c0_53 = arith.constant 0 : index
      %58 = tpu.strided_load %arg8[%57, %c1_52, %c0_53] {strides = array<i32: 1, 2, 1>} : memref<18x18x4xf32, #tpu.memory_space<vmem>>, vector<1x8x4xf32>
      %59 = vector.shape_cast %58 : vector<1x8x4xf32> to vector<8x4xf32>
      %60 = arith.truncf %59 : vector<8x4xf32> to vector<8x4xbf16>
      %c4 = arith.constant 4 : index
      %c0_54 = arith.constant 0 : index
      %c0_55 = arith.constant 0 : index
      %61 = vector.load %arg2[%c4, %c0_54, %c0_55] : memref<9x4x8xbf16, #tpu.memory_space<vmem>>, vector<1x4x8xbf16>
      %62 = vector.shape_cast %61 : vector<1x4x8xbf16> to vector<4x8xbf16>
      %cst_56 = arith.constant dense<0.000000e+00> : vector<8x8xf32>
      %63 = tpu.matmul %60, %62, %cst_56 {dimension_numbers = #tpu.dot_dimension_numbers<[1], [0], [0], [1], [0, 0, 1, 1], [], []>} : vector<8x4xbf16>, vector<4x8xbf16>, vector<8x8xf32> -> vector<8x8xf32>
      %64 = arith.addf %54, %63 : vector<8x8xf32>
      %c2_i32_57 = arith.constant 2 : i32
      %65 = arith.muli %arg10, %c2_i32_57 : i32
      %c1_i32_58 = arith.constant 1 : i32
      %66 = arith.addi %65, %c1_i32_58 : i32
      %67 = arith.index_cast %66 : i32 to index
      %c2_59 = arith.constant 2 : index
      %c0_60 = arith.constant 0 : index
      %68 = tpu.strided_load %arg8[%67, %c2_59, %c0_60] {strides = array<i32: 1, 2, 1>} : memref<18x18x4xf32, #tpu.memory_space<vmem>>, vector<1x8x4xf32>
      %69 = vector.shape_cast %68 : vector<1x8x4xf32> to vector<8x4xf32>
      %70 = arith.truncf %69 : vector<8x4xf32> to vector<8x4xbf16>
      %c5 = arith.constant 5 : index
      %c0_61 = arith.constant 0 : index
      %c0_62 = arith.constant 0 : index
      %71 = vector.load %arg2[%c5, %c0_61, %c0_62] : memref<9x4x8xbf16, #tpu.memory_space<vmem>>, vector<1x4x8xbf16>
      %72 = vector.shape_cast %71 : vector<1x4x8xbf16> to vector<4x8xbf16>
      %cst_63 = arith.constant dense<0.000000e+00> : vector<8x8xf32>
      %73 = tpu.matmul %70, %72, %cst_63 {dimension_numbers = #tpu.dot_dimension_numbers<[1], [0], [0], [1], [0, 0, 1, 1], [], []>} : vector<8x4xbf16>, vector<4x8xbf16>, vector<8x8xf32> -> vector<8x8xf32>
      %74 = arith.addf %64, %73 : vector<8x8xf32>
      %c2_i32_64 = arith.constant 2 : i32
      %75 = arith.muli %arg10, %c2_i32_64 : i32
      %c2_i32_65 = arith.constant 2 : i32
      %76 = arith.addi %75, %c2_i32_65 : i32
      %77 = arith.index_cast %76 : i32 to index
      %c0_66 = arith.constant 0 : index
      %c0_67 = arith.constant 0 : index
      %78 = tpu.strided_load %arg8[%77, %c0_66, %c0_67] {strides = array<i32: 1, 2, 1>} : memref<18x18x4xf32, #tpu.memory_space<vmem>>, vector<1x8x4xf32>
      %79 = vector.shape_cast %78 : vector<1x8x4xf32> to vector<8x4xf32>
      %80 = arith.truncf %79 : vector<8x4xf32> to vector<8x4xbf16>
      %c6 = arith.constant 6 : index
      %c0_68 = arith.constant 0 : index
      %c0_69 = arith.constant 0 : index
      %81 = vector.load %arg2[%c6, %c0_68, %c0_69] : memref<9x4x8xbf16, #tpu.memory_space<vmem>>, vector<1x4x8xbf16>
      %82 = vector.shape_cast %81 : vector<1x4x8xbf16> to vector<4x8xbf16>
      %cst_70 = arith.constant dense<0.000000e+00> : vector<8x8xf32>
      %83 = tpu.matmul %80, %82, %cst_70 {dimension_numbers = #tpu.dot_dimension_numbers<[1], [0], [0], [1], [0, 0, 1, 1], [], []>} : vector<8x4xbf16>, vector<4x8xbf16>, vector<8x8xf32> -> vector<8x8xf32>
      %84 = arith.addf %74, %83 : vector<8x8xf32>
      %c2_i32_71 = arith.constant 2 : i32
      %85 = arith.muli %arg10, %c2_i32_71 : i32
      %c2_i32_72 = arith.constant 2 : i32
      %86 = arith.addi %85, %c2_i32_72 : i32
      %87 = arith.index_cast %86 : i32 to index
      %c1_73 = arith.constant 1 : index
      %c0_74 = arith.constant 0 : index
      %88 = tpu.strided_load %arg8[%87, %c1_73, %c0_74] {strides = array<i32: 1, 2, 1>} : memref<18x18x4xf32, #tpu.memory_space<vmem>>, vector<1x8x4xf32>
      %89 = vector.shape_cast %88 : vector<1x8x4xf32> to vector<8x4xf32>
      %90 = arith.truncf %89 : vector<8x4xf32> to vector<8x4xbf16>
      %c7 = arith.constant 7 : index
      %c0_75 = arith.constant 0 : index
      %c0_76 = arith.constant 0 : index
      %91 = vector.load %arg2[%c7, %c0_75, %c0_76] : memref<9x4x8xbf16, #tpu.memory_space<vmem>>, vector<1x4x8xbf16>
      %92 = vector.shape_cast %91 : vector<1x4x8xbf16> to vector<4x8xbf16>
      %cst_77 = arith.constant dense<0.000000e+00> : vector<8x8xf32>
      %93 = tpu.matmul %90, %92, %cst_77 {dimension_numbers = #tpu.dot_dimension_numbers<[1], [0], [0], [1], [0, 0, 1, 1], [], []>} : vector<8x4xbf16>, vector<4x8xbf16>, vector<8x8xf32> -> vector<8x8xf32>
      %94 = arith.addf %84, %93 : vector<8x8xf32>
      %c2_i32_78 = arith.constant 2 : i32
      %95 = arith.muli %arg10, %c2_i32_78 : i32
      %c2_i32_79 = arith.constant 2 : i32
      %96 = arith.addi %95, %c2_i32_79 : i32
      %97 = arith.index_cast %96 : i32 to index
      %c2_80 = arith.constant 2 : index
      %c0_81 = arith.constant 0 : index
      %98 = tpu.strided_load %arg8[%97, %c2_80, %c0_81] {strides = array<i32: 1, 2, 1>} : memref<18x18x4xf32, #tpu.memory_space<vmem>>, vector<1x8x4xf32>
      %99 = vector.shape_cast %98 : vector<1x8x4xf32> to vector<8x4xf32>
      %100 = arith.truncf %99 : vector<8x4xf32> to vector<8x4xbf16>
      %c8 = arith.constant 8 : index
      %c0_82 = arith.constant 0 : index
      %c0_83 = arith.constant 0 : index
      %101 = vector.load %arg2[%c8, %c0_82, %c0_83] : memref<9x4x8xbf16, #tpu.memory_space<vmem>>, vector<1x4x8xbf16>
      %102 = vector.shape_cast %101 : vector<1x4x8xbf16> to vector<4x8xbf16>
      %cst_84 = arith.constant dense<0.000000e+00> : vector<8x8xf32>
      %103 = tpu.matmul %100, %102, %cst_84 {dimension_numbers = #tpu.dot_dimension_numbers<[1], [0], [0], [1], [0, 0, 1, 1], [], []>} : vector<8x4xbf16>, vector<4x8xbf16>, vector<8x8xf32> -> vector<8x8xf32>
      %104 = arith.addf %94, %103 : vector<8x8xf32>
      %cst_85 = arith.constant 0.000000e+00 : f32
      %105 = vector.broadcast %cst_85 : f32 to vector<8x8xf32>
      %106 = arith.maximumf %104, %105 : vector<8x8xf32>
      %107 = arith.truncf %106 : vector<8x8xf32> to vector<8x8xbf16>
      %c1_i32_86 = arith.constant 1 : i32
      %108 = arith.addi %arg10, %c1_i32_86 : i32
      %109 = arith.index_cast %108 : i32 to index
      %c1_87 = arith.constant 1 : index
      %c0_88 = arith.constant 0 : index
      %110 = vector.load %arg9[%109, %c1_87, %c0_88] : memref<10x10x8xbf16, #tpu.memory_space<vmem>>, vector<1x8x8xbf16>
      %111 = vector.shape_cast %110 : vector<1x8x8xbf16> to vector<8x8xbf16>
      %112 = vector.shape_cast %107 : vector<8x8xbf16> to vector<1x8x8xbf16>
      tpu.vector_store %arg9[%109, %c1_87, %c0_88], %112 {strides = array<i32>} : memref<10x10x8xbf16, #tpu.memory_space<vmem>>, vector<1x8x8xbf16>,
    }
    %c8_i32_16 = arith.constant 8 : i32
    %c0_i32_17 = arith.constant 0 : i32
    %c8_i32_18 = arith.constant 8 : i32
    %14 = arith.addi %c0_i32_17, %c8_i32_18 : i32
    %c1_i32_19 = arith.constant 1 : i32
    scf.for %arg10 = %c0_i32_17 to %14 step %c1_i32_19  : i32 {
      %c0_i32_21 = arith.constant 0 : i32
      %15 = arith.addi %arg10, %c0_i32_21 : i32
      %16 = arith.index_cast %15 : i32 to index
      %c0_22 = arith.constant 0 : index
      %c0_23 = arith.constant 0 : index
      %17 = vector.load %arg9[%16, %c0_22, %c0_23] : memref<10x10x8xbf16, #tpu.memory_space<vmem>>, vector<1x8x8xbf16>
      %18 = vector.shape_cast %17 : vector<1x8x8xbf16> to vector<8x8xbf16>
      %c0_24 = arith.constant 0 : index
      %c0_25 = arith.constant 0 : index
      %c0_26 = arith.constant 0 : index
      %19 = vector.load %arg4[%c0_24, %c0_25, %c0_26] : memref<9x8x8xbf16, #tpu.memory_space<vmem>>, vector<1x8x8xbf16>
      %20 = vector.shape_cast %19 : vector<1x8x8xbf16> to vector<8x8xbf16>
      %cst_27 = arith.constant dense<0.000000e+00> : vector<8x8xf32>
      %21 = tpu.matmul %18, %20, %cst_27 {dimension_numbers = #tpu.dot_dimension_numbers<[1], [0], [0], [1], [0, 0, 1, 1], [], []>} : vector<8x8xbf16>, vector<8x8xbf16>, vector<8x8xf32> -> vector<8x8xf32>
      %22 = arith.addf %12, %21 : vector<8x8xf32>
      %c0_i32_28 = arith.constant 0 : i32
      %23 = arith.addi %arg10, %c0_i32_28 : i32
      %24 = arith.index_cast %23 : i32 to index
      %c1_29 = arith.constant 1 : index
      %c0_30 = arith.constant 0 : index
      %25 = vector.load %arg9[%24, %c1_29, %c0_30] : memref<10x10x8xbf16, #tpu.memory_space<vmem>>, vector<1x8x8xbf16>
      %26 = vector.shape_cast %25 : vector<1x8x8xbf16> to vector<8x8xbf16>
      %c1_31 = arith.constant 1 : index
      %c0_32 = arith.constant 0 : index
      %c0_33 = arith.constant 0 : index
      %27 = vector.load %arg4[%c1_31, %c0_32, %c0_33] : memref<9x8x8xbf16, #tpu.memory_space<vmem>>, vector<1x8x8xbf16>
      %28 = vector.shape_cast %27 : vector<1x8x8xbf16> to vector<8x8xbf16>
      %cst_34 = arith.constant dense<0.000000e+00> : vector<8x8xf32>
      %29 = tpu.matmul %26, %28, %cst_34 {dimension_numbers = #tpu.dot_dimension_numbers<[1], [0], [0], [1], [0, 0, 1, 1], [], []>} : vector<8x8xbf16>, vector<8x8xbf16>, vector<8x8xf32> -> vector<8x8xf32>
      %30 = arith.addf %22, %29 : vector<8x8xf32>
      %c0_i32_35 = arith.constant 0 : i32
      %31 = arith.addi %arg10, %c0_i32_35 : i32
      %32 = arith.index_cast %31 : i32 to index
      %c2 = arith.constant 2 : index
      %c0_36 = arith.constant 0 : index
      %33 = vector.load %arg9[%32, %c2, %c0_36] : memref<10x10x8xbf16, #tpu.memory_space<vmem>>, vector<1x8x8xbf16>
      %34 = vector.shape_cast %33 : vector<1x8x8xbf16> to vector<8x8xbf16>
      %c2_37 = arith.constant 2 : index
      %c0_38 = arith.constant 0 : index
      %c0_39 = arith.constant 0 : index
      %35 = vector.load %arg4[%c2_37, %c0_38, %c0_39] : memref<9x8x8xbf16, #tpu.memory_space<vmem>>, vector<1x8x8xbf16>
      %36 = vector.shape_cast %35 : vector<1x8x8xbf16> to vector<8x8xbf16>
      %cst_40 = arith.constant dense<0.000000e+00> : vector<8x8xf32>
      %37 = tpu.matmul %34, %36, %cst_40 {dimension_numbers = #tpu.dot_dimension_numbers<[1], [0], [0], [1], [0, 0, 1, 1], [], []>} : vector<8x8xbf16>, vector<8x8xbf16>, vector<8x8xf32> -> vector<8x8xf32>
      %38 = arith.addf %30, %37 : vector<8x8xf32>
      %c1_i32_41 = arith.constant 1 : i32
      %39 = arith.addi %arg10, %c1_i32_41 : i32
      %40 = arith.index_cast %39 : i32 to index
      %c0_42 = arith.constant 0 : index
      %c0_43 = arith.constant 0 : index
      %41 = vector.load %arg9[%40, %c0_42, %c0_43] : memref<10x10x8xbf16, #tpu.memory_space<vmem>>, vector<1x8x8xbf16>
      %42 = vector.shape_cast %41 : vector<1x8x8xbf16> to vector<8x8xbf16>
      %c3 = arith.constant 3 : index
      %c0_44 = arith.constant 0 : index
      %c0_45 = arith.constant 0 : index
      %43 = vector.load %arg4[%c3, %c0_44, %c0_45] : memref<9x8x8xbf16, #tpu.memory_space<vmem>>, vector<1x8x8xbf16>
      %44 = vector.shape_cast %43 : vector<1x8x8xbf16> to vector<8x8xbf16>
      %cst_46 = arith.constant dense<0.000000e+00> : vector<8x8xf32>
      %45 = tpu.matmul %42, %44, %cst_46 {dimension_numbers = #tpu.dot_dimension_numbers<[1], [0], [0], [1], [0, 0, 1, 1], [], []>} : vector<8x8xbf16>, vector<8x8xbf16>, vector<8x8xf32> -> vector<8x8xf32>
      %46 = arith.addf %38, %45 : vector<8x8xf32>
      %c1_i32_47 = arith.constant 1 : i32
      %47 = arith.addi %arg10, %c1_i32_47 : i32
      %48 = arith.index_cast %47 : i32 to index
      %c1_48 = arith.constant 1 : index
      %c0_49 = arith.constant 0 : index
      %49 = vector.load %arg9[%48, %c1_48, %c0_49] : memref<10x10x8xbf16, #tpu.memory_space<vmem>>, vector<1x8x8xbf16>
      %50 = vector.shape_cast %49 : vector<1x8x8xbf16> to vector<8x8xbf16>
      %c4 = arith.constant 4 : index
      %c0_50 = arith.constant 0 : index
      %c0_51 = arith.constant 0 : index
      %51 = vector.load %arg4[%c4, %c0_50, %c0_51] : memref<9x8x8xbf16, #tpu.memory_space<vmem>>, vector<1x8x8xbf16>
      %52 = vector.shape_cast %51 : vector<1x8x8xbf16> to vector<8x8xbf16>
      %cst_52 = arith.constant dense<0.000000e+00> : vector<8x8xf32>
      %53 = tpu.matmul %50, %52, %cst_52 {dimension_numbers = #tpu.dot_dimension_numbers<[1], [0], [0], [1], [0, 0, 1, 1], [], []>} : vector<8x8xbf16>, vector<8x8xbf16>, vector<8x8xf32> -> vector<8x8xf32>
      %54 = arith.addf %46, %53 : vector<8x8xf32>
      %c1_i32_53 = arith.constant 1 : i32
      %55 = arith.addi %arg10, %c1_i32_53 : i32
      %56 = arith.index_cast %55 : i32 to index
      %c2_54 = arith.constant 2 : index
      %c0_55 = arith.constant 0 : index
      %57 = vector.load %arg9[%56, %c2_54, %c0_55] : memref<10x10x8xbf16, #tpu.memory_space<vmem>>, vector<1x8x8xbf16>
      %58 = vector.shape_cast %57 : vector<1x8x8xbf16> to vector<8x8xbf16>
      %c5 = arith.constant 5 : index
      %c0_56 = arith.constant 0 : index
      %c0_57 = arith.constant 0 : index
      %59 = vector.load %arg4[%c5, %c0_56, %c0_57] : memref<9x8x8xbf16, #tpu.memory_space<vmem>>, vector<1x8x8xbf16>
      %60 = vector.shape_cast %59 : vector<1x8x8xbf16> to vector<8x8xbf16>
      %cst_58 = arith.constant dense<0.000000e+00> : vector<8x8xf32>
      %61 = tpu.matmul %58, %60, %cst_58 {dimension_numbers = #tpu.dot_dimension_numbers<[1], [0], [0], [1], [0, 0, 1, 1], [], []>} : vector<8x8xbf16>, vector<8x8xbf16>, vector<8x8xf32> -> vector<8x8xf32>
      %62 = arith.addf %54, %61 : vector<8x8xf32>
      %c2_i32 = arith.constant 2 : i32
      %63 = arith.addi %arg10, %c2_i32 : i32
      %64 = arith.index_cast %63 : i32 to index
      %c0_59 = arith.constant 0 : index
      %c0_60 = arith.constant 0 : index
      %65 = vector.load %arg9[%64, %c0_59, %c0_60] : memref<10x10x8xbf16, #tpu.memory_space<vmem>>, vector<1x8x8xbf16>
      %66 = vector.shape_cast %65 : vector<1x8x8xbf16> to vector<8x8xbf16>
      %c6 = arith.constant 6 : index
      %c0_61 = arith.constant 0 : index
      %c0_62 = arith.constant 0 : index
      %67 = vector.load %arg4[%c6, %c0_61, %c0_62] : memref<9x8x8xbf16, #tpu.memory_space<vmem>>, vector<1x8x8xbf16>
      %68 = vector.shape_cast %67 : vector<1x8x8xbf16> to vector<8x8xbf16>
      %cst_63 = arith.constant dense<0.000000e+00> : vector<8x8xf32>
      %69 = tpu.matmul %66, %68, %cst_63 {dimension_numbers = #tpu.dot_dimension_numbers<[1], [0], [0], [1], [0, 0, 1, 1], [], []>} : vector<8x8xbf16>, vector<8x8xbf16>, vector<8x8xf32> -> vector<8x8xf32>
      %70 = arith.addf %62, %69 : vector<8x8xf32>
      %c2_i32_64 = arith.constant 2 : i32
      %71 = arith.addi %arg10, %c2_i32_64 : i32
      %72 = arith.index_cast %71 : i32 to index
      %c1_65 = arith.constant 1 : index
      %c0_66 = arith.constant 0 : index
      %73 = vector.load %arg9[%72, %c1_65, %c0_66] : memref<10x10x8xbf16, #tpu.memory_space<vmem>>, vector<1x8x8xbf16>
      %74 = vector.shape_cast %73 : vector<1x8x8xbf16> to vector<8x8xbf16>
      %c7 = arith.constant 7 : index
      %c0_67 = arith.constant 0 : index
      %c0_68 = arith.constant 0 : index
      %75 = vector.load %arg4[%c7, %c0_67, %c0_68] : memref<9x8x8xbf16, #tpu.memory_space<vmem>>, vector<1x8x8xbf16>
      %76 = vector.shape_cast %75 : vector<1x8x8xbf16> to vector<8x8xbf16>
      %cst_69 = arith.constant dense<0.000000e+00> : vector<8x8xf32>
      %77 = tpu.matmul %74, %76, %cst_69 {dimension_numbers = #tpu.dot_dimension_numbers<[1], [0], [0], [1], [0, 0, 1, 1], [], []>} : vector<8x8xbf16>, vector<8x8xbf16>, vector<8x8xf32> -> vector<8x8xf32>
      %78 = arith.addf %70, %77 : vector<8x8xf32>
      %c2_i32_70 = arith.constant 2 : i32
      %79 = arith.addi %arg10, %c2_i32_70 : i32
      %80 = arith.index_cast %79 : i32 to index
      %c2_71 = arith.constant 2 : index
      %c0_72 = arith.constant 0 : index
      %81 = vector.load %arg9[%80, %c2_71, %c0_72] : memref<10x10x8xbf16, #tpu.memory_space<vmem>>, vector<1x8x8xbf16>
      %82 = vector.shape_cast %81 : vector<1x8x8xbf16> to vector<8x8xbf16>
      %c8 = arith.constant 8 : index
      %c0_73 = arith.constant 0 : index
      %c0_74 = arith.constant 0 : index
      %83 = vector.load %arg4[%c8, %c0_73, %c0_74] : memref<9x8x8xbf16, #tpu.memory_space<vmem>>, vector<1x8x8xbf16>
      %84 = vector.shape_cast %83 : vector<1x8x8xbf16> to vector<8x8xbf16>
      %cst_75 = arith.constant dense<0.000000e+00> : vector<8x8xf32>
      %85 = tpu.matmul %82, %84, %cst_75 {dimension_numbers = #tpu.dot_dimension_numbers<[1], [0], [0], [1], [0, 0, 1, 1], [], []>} : vector<8x8xbf16>, vector<8x8xbf16>, vector<8x8xf32> -> vector<8x8xf32>
      %86 = arith.addf %78, %85 : vector<8x8xf32>
      %c2_i32_76 = arith.constant 2 : i32
      %87 = arith.muli %arg10, %c2_i32_76 : i32
      %c1_i32_77 = arith.constant 1 : i32
      %88 = arith.addi %c1_i32_77, %87 : i32
      %89 = arith.index_cast %88 : i32 to index
      %c1_78 = arith.constant 1 : index
      %c0_79 = arith.constant 0 : index
      %90 = tpu.strided_load %arg8[%89, %c1_78, %c0_79] {strides = array<i32: 1, 2, 1>} : memref<18x18x4xf32, #tpu.memory_space<vmem>>, vector<1x8x4xf32>
      %91 = vector.shape_cast %90 : vector<1x8x4xf32> to vector<8x4xf32>
      %92 = arith.truncf %91 : vector<8x4xf32> to vector<8x4xbf16>
      %c0_80 = arith.constant 0 : index
      %c0_81 = arith.constant 0 : index
      %93 = vector.load %arg6[%c0_80, %c0_81] : memref<4x8xbf16, #tpu.memory_space<vmem>>, vector<4x8xbf16>
      %cst_82 = arith.constant dense<0.000000e+00> : vector<8x8xf32>
      %94 = tpu.matmul %92, %93, %cst_82 {dimension_numbers = #tpu.dot_dimension_numbers<[1], [0], [0], [1], [0, 0, 1, 1], [], []>} : vector<8x4xbf16>, vector<4x8xbf16>, vector<8x8xf32> -> vector<8x8xf32>
      %95 = arith.addf %86, %94 : vector<8x8xf32>
      %cst_83 = arith.constant 0.000000e+00 : f32
      %96 = vector.broadcast %cst_83 : f32 to vector<8x8xf32>
      %97 = arith.maximumf %95, %96 : vector<8x8xf32>
      %c0_84 = arith.constant 0 : index
      %98 = arith.index_cast %arg10 : i32 to index
      %c0_85 = arith.constant 0 : index
      %c0_86 = arith.constant 0 : index
      %99 = vector.load %arg7[%c0_84, %98, %c0_85, %c0_86] : memref<1x8x8x8xf32, #tpu.memory_space<vmem>>, vector<1x1x8x8xf32>
      %100 = vector.shape_cast %99 : vector<1x1x8x8xf32> to vector<8x8xf32>
      %101 = vector.shape_cast %97 : vector<8x8xf32> to vector<1x1x8x8xf32>
      tpu.vector_store %arg7[%c0_84, %98, %c0_85, %c0_86], %101 {strides = array<i32>} : memref<1x8x8x8xf32, #tpu.memory_space<vmem>>, vector<1x1x8x8xf32>,
    }
    %c8_i32_20 = arith.constant 8 : i32
    return
  }
  func.func @transform_0(%arg0: i32) -> (i32, i32, i32, i32) {
    %c0_i32 = arith.constant 0 : i32
    %c0_i32_0 = arith.constant 0 : i32
    %c0_i32_1 = arith.constant 0 : i32
    %c0_i32_2 = arith.constant 0 : i32
    return %arg0, %c0_i32, %c0_i32_0, %c0_i32_1 : i32, i32, i32, i32
  }
  func.func @transform_1(%arg0: i32) -> (i32, i32, i32) {
    %c0_i32 = arith.constant 0 : i32
    %c0_i32_0 = arith.constant 0 : i32
    %c0_i32_1 = arith.constant 0 : i32
    %c0_i32_2 = arith.constant 0 : i32
    return %c0_i32, %c0_i32_0, %c0_i32_1 : i32, i32, i32
  }
  func.func @transform_2(%arg0: i32) -> (i32, i32) {
    %c0_i32 = arith.constant 0 : i32
    %c0_i32_0 = arith.constant 0 : i32
    %c0_i32_1 = arith.constant 0 : i32
    return %c0_i32, %c0_i32_0 : i32, i32
  }
  func.func @transform_3(%arg0: i32) -> (i32, i32, i32) {
    %c0_i32 = arith.constant 0 : i32
    %c0_i32_0 = arith.constant 0 : i32
    %c0_i32_1 = arith.constant 0 : i32
    %c0_i32_2 = arith.constant 0 : i32
    return %c0_i32, %c0_i32_0, %c0_i32_1 : i32, i32, i32
  }
  func.func @transform_4(%arg0: i32) -> (i32, i32) {
    %c0_i32 = arith.constant 0 : i32
    %c0_i32_0 = arith.constant 0 : i32
    %c0_i32_1 = arith.constant 0 : i32
    return %c0_i32, %c0_i32_0 : i32, i32
  }
  func.func @transform_5(%arg0: i32) -> (i32, i32) {
    %c0_i32 = arith.constant 0 : i32
    %c0_i32_0 = arith.constant 0 : i32
    %c0_i32_1 = arith.constant 0 : i32
    return %c0_i32, %c0_i32_0 : i32, i32
  }
  func.func @transform_6(%arg0: i32) -> (i32, i32, i32, i32) {
    %c0_i32 = arith.constant 0 : i32
    %c0_i32_0 = arith.constant 0 : i32
    %c0_i32_1 = arith.constant 0 : i32
    %c0_i32_2 = arith.constant 0 : i32
    return %arg0, %c0_i32, %c0_i32_0, %c0_i32_1 : i32, i32, i32, i32
  }
}

</mosaic_0001>

<bundles_post_ra>
// kernel: normal_block_forward.1
= control target key start
LH: loop header
LB: loop body
LE: loop exit
PB: predicated region body
PF: predicated region fallthrough
CT: control target
= control target key end

     0   :  { %s1247_s21 = smov 0   ;;  %s1624_s0 = inlined_call_operand.vmem [shape: f32[2,16,16,4], index: 0, kind: input, shape index: {}]   ;;  %s1625_s1 = inlined_call_operand.vmem [shape: bf16[9,4,8], index: 1, kind: input, shape index: {}]   ;;  %s1626_s2 = inlined_call_operand.vmem [shape: f32[1,8], index: 2, kind: input, shape index: {}]   ;;  %s1627_s3 = inlined_call_operand.vmem [shape: bf16[9,8,8], index: 3, kind: input, shape index: {}]   ;;  %s1628_s4 = inlined_call_operand.vmem [shape: f32[1,8], index: 4, kind: input, shape index: {}]   ;;  %s1629_s5 = inlined_call_operand.vmem [shape: bf16[4,8], index: 5, kind: input, shape index: {}]   ;;  %s1630_s6 = inlined_call_operand.vmem [shape: f32[2,8,8,8], index: 6, kind: output, shape index: {}]  }
   0x1 LB: > { %s1074_s22 = sadd.s32 4294967295, %s1200_s21   ;;  %p1078_p0 = scmp.ge.s32.totalorder %s1200_s21, 1  ;;  %s1200_s21 = sphi %s1247_s21, %s16_s21  }
   0x2   : > { %p212_p1 = scmp.lt.s32.totalorder %s1200_s21, 3 }
   0x4   : > { %p213_p2 = pnand %p1078_p0, %p212_p1 }
   0x5   : > { %p242_p3 = scmp.lt.s32.totalorder (!%p213_p2), %s1074_s22, 1  ;;  %s1471_s11 = smov (!%p213_p2), 0  }
   0x6   : > { %216 = sbr.rel (%p213_p2) target bundleno = 484 (0x1e4), region = 44 }
   0xb   : > { %vm253_vm0 = vcmask 31744   ;;  %v1210_v0 = vmov 0.0   ;;  %s1632_s22 = smov (!%p242_p3, %s1074_s22), 1  ;;  %v1268_v1 = vld [vmem:[%s1626_s2] ss:$0 sm:$0xff]  ;;  %vm256_vm1 = vcmask 25600  }
   0xc   : > { %258 = vst.msk [vmem:[#allocation2 + $0x18] sm:$0xff] %vm253_vm0, %v1210_v0  ;;  %v1273_v2 = vld [vmem:[%s1628_s4] ss:$0 sm:$0xff]  ;;  %s1156_s27 = sshll.u32 %s1632_s22, 6  ;;  %s1155_s7 = sshll.u32 %s1632_s22, 8  ;;  %vm374_vm2 = vcmask 60416  }
   0xd   : > { %254 = vst.msk [vmem:[#allocation2] sm:$0xff] %vm253_vm0, %v1210_v0  ;;  %s1283_s30 = scalar_lea.vmem %s1630_s6, %s1156_s27  ;;  %s1375_s10 = scalar_lea.vmem %s1624_s0, %s1155_s7  ;;  %v1211_v35 = vmov 0   ;;  %vm376_vm3 = vcmask 57344  }
   0xe   : > { %255 = vst.msk [vmem:[#allocation2 + $0x8] sm:$0xff] %vm253_vm0, %v1210_v0  ;;  %v309_v3 = vld [vmem:[%s1375_s10] sm:$0xff]  ;;  %v310_v4 = vld [vmem:[%s1375_s10 + $0x8] sm:$0xff]  ;;  %v311_v5 = vld [vmem:[%s1375_s10 + $0x10] sm:$0xff] }
   0xf   : > { %259 = vst.msk [vmem:[#allocation2 + $0x20] sm:$0xff] %vm253_vm0, %v1210_v0  ;;  %v312_v6 = vld [vmem:[%s1375_s10 + $0x18] sm:$0xff]  ;;  %v313_v7 = vld [vmem:[%s1375_s10 + $0x20] sm:$0xff]  ;;  %v314_v8 = vld [vmem:[%s1375_s10 + $0x28] sm:$0xff] }
  0x10   : > { %261 = vst.msk [vmem:[#allocation2 + $0x30] sm:$0xff] %vm253_vm0, %v1210_v0  ;;  %v315_v9 = vld [vmem:[%s1375_s10 + $0x30] sm:$0xff]  ;;  %v316_v10 = vld [vmem:[%s1375_s10 + $0x38] sm:$0xff]  ;;  %v317_v11 = vld [vmem:[%s1375_s10 + $0x40] sm:$0xff] }
  0x11   : > { %262 = vst.msk [vmem:[#allocation2 + $0x38] sm:$0xff] %vm253_vm0, %v1210_v0  ;;  %v318_v12 = vld [vmem:[%s1375_s10 + $0x48] sm:$0xff]  ;;  %v319_v13 = vld [vmem:[%s1375_s10 + $0x50] sm:$0xff]  ;;  %v320_v14 = vld [vmem:[%s1375_s10 + $0x58] sm:$0xff] }
  0x12   : > { %264 = vst.msk [vmem:[#allocation2 + $0x48] sm:$0xff] %vm253_vm0, %v1210_v0  ;;  %v321_v15 = vld [vmem:[%s1375_s10 + $0x60] sm:$0xff]  ;;  %v322_v16 = vld [vmem:[%s1375_s10 + $0x68] sm:$0xff]  ;;  %v323_v17 = vld [vmem:[%s1375_s10 + $0x70] sm:$0xff] }
  0x13   : > { %265 = vst.msk [vmem:[#allocation2 + $0x50] sm:$0xff] %vm253_vm0, %v1210_v0  ;;  %v324_v18 = vld [vmem:[%s1375_s10 + $0x78] sm:$0xff]  ;;  %v325_v19 = vld [vmem:[%s1375_s10 + $0x80] sm:$0xff]  ;;  %v326_v20 = vld [vmem:[%s1375_s10 + $0x88] sm:$0xff] }
  0x14   : > { %267 = vst.msk [vmem:[#allocation2 + $0x60] sm:$0xff] %vm253_vm0, %v1210_v0  ;;  %v327_v21 = vld [vmem:[%s1375_s10 + $0x90] sm:$0xff]  ;;  %v328_v22 = vld [vmem:[%s1375_s10 + $0x98] sm:$0xff]  ;;  %v329_v23 = vld [vmem:[%s1375_s10 + $0xa0] sm:$0xff] }
  0x15   : > { %268 = vst.msk [vmem:[#allocation2 + $0x68] sm:$0xff] %vm253_vm0, %v1210_v0  ;;  %v330_v24 = vld [vmem:[%s1375_s10 + $0xa8] sm:$0xff]  ;;  %v331_v25 = vld [vmem:[%s1375_s10 + $0xb0] sm:$0xff]  ;;  %v332_v26 = vld [vmem:[%s1375_s10 + $0xb8] sm:$0xff] }
  0x16   : > { %270 = vst.msk [vmem:[#allocation2 + $0x78] sm:$0xff] %vm253_vm0, %v1210_v0  ;;  %v333_v27 = vld [vmem:[%s1375_s10 + $0xc0] sm:$0xff]  ;;  %v334_v28 = vld [vmem:[%s1375_s10 + $0xc8] sm:$0xff]  ;;  %v335_v29 = vld [vmem:[%s1375_s10 + $0xd0] sm:$0xff] }
  0x17   : > { %271 = vst.msk [vmem:[#allocation2 + $0x80] sm:$0xff] %vm253_vm0, %v1210_v0  ;;  %v336_v30 = vld [vmem:[%s1375_s10 + $0xd8] sm:$0xff]  ;;  %v337_v31 = vld [vmem:[%s1375_s10 + $0xe0] sm:$0xff]  ;;  %v338_v32 = vld [vmem:[%s1375_s10 + $0xe8] sm:$0xff] }
  0x18   : > { %273 = vst.msk [vmem:[#allocation2 + $0x90] sm:$0xff] %vm253_vm0, %v1210_v0  ;;  %v339_v33 = vld [vmem:[%s1375_s10 + $0xf0] sm:$0xff]  ;;  %v340_v34 = vld [vmem:[%s1375_s10 + $0xf8] sm:$0xff] }
  0x19   : > { %274 = vst.msk [vmem:[#allocation2 + $0x98] sm:$0xff] %vm253_vm0, %v1210_v0 }
  0x1a   : > { %276 = vst.msk [vmem:[#allocation2 + $0xa8] sm:$0xff] %vm253_vm0, %v1210_v0 }
  0x1b   : > { %277 = vst.msk [vmem:[#allocation2 + $0xb0] sm:$0xff] %vm253_vm0, %v1210_v0 }
  0x1c   : > { %279 = vst.msk [vmem:[#allocation2 + $0xc0] sm:$0xff] %vm253_vm0, %v1210_v0 }
  0x1d   : > { %280 = vst.msk [vmem:[#allocation2 + $0xc8] sm:$0xff] %vm253_vm0, %v1210_v0 }
  0x1e   : > { %282 = vst.msk [vmem:[#allocation2 + $0xd8] sm:$0xff] %vm253_vm0, %v1210_v0 }
  0x1f   : > { %283 = vst.msk [vmem:[#allocation2 + $0xe0] sm:$0xff] %vm253_vm0, %v1210_v0 }
  0x20   : > { %285 = vst.msk [vmem:[#allocation2 + $0xf0] sm:$0xff] %vm253_vm0, %v1210_v0 }
  0x21   : > { %286 = vst.msk [vmem:[#allocation2 + $0xf8] sm:$0xff] %vm253_vm0, %v1210_v0 }
  0x22   : > { %288 = vst.msk [vmem:[#allocation2 + $0x108] sm:$0xff] %vm253_vm0, %v1210_v0 }
  0x23   : > { %289 = vst.msk [vmem:[#allocation2 + $0x110] sm:$0xff] %vm253_vm0, %v1210_v0 }
  0x24   : > { %291 = vst.msk [vmem:[#allocation2 + $0x120] sm:$0xff] %vm253_vm0, %v1210_v0 }
  0x25   : > { %292 = vst.msk [vmem:[#allocation2 + $0x128] sm:$0xff] %vm253_vm0, %v1210_v0 }
  0x26   : > { %294 = vst.msk [vmem:[#allocation2 + $0x138] sm:$0xff] %vm253_vm0, %v1210_v0 }
  0x27   : > { %295 = vst.msk [vmem:[#allocation2 + $0x140] sm:$0xff] %vm253_vm0, %v1210_v0 }
  0x28   : > { %297 = vst.msk [vmem:[#allocation2 + $0x150] sm:$0xff] %vm253_vm0, %v1210_v0 }
  0x29   : > { %298 = vst.msk [vmem:[#allocation2 + $0x158] sm:$0xff] %vm253_vm0, %v1210_v0 }
  0x2a   : > { %300 = vst.msk [vmem:[#allocation2 + $0x168] sm:$0xff] %vm253_vm0, %v1210_v0 }
  0x2b   : > { %301 = vst.msk [vmem:[#allocation2 + $0x170] sm:$0xff] %vm253_vm0, %v1210_v0 }
  0x2c   : > { %303 = vst.msk [vmem:[#allocation2 + $0x180] sm:$0xff] %vm253_vm0, %v1210_v0 }
  0x2d   : > { %304 = vst.msk [vmem:[#allocation2 + $0x188] sm:$0xff] %vm253_vm0, %v1210_v0 }
  0x2e   : > { %306 = vst.msk [vmem:[#allocation2 + $0x198] sm:$0xff] %vm253_vm0, %v1210_v0 }
  0x2f   : > { %307 = vst.msk [vmem:[#allocation2 + $0x1a0] sm:$0xff] %vm253_vm0, %v1210_v0 }
  0x30   : > { %260 = vst.msk [vmem:[#allocation2 + $0x28] sm:$0x3] %vm256_vm1, %v1210_v0 }
  0x31   : > { %257 = vst.msk [vmem:[#allocation2 + $0x10] sm:$0x3] %vm256_vm1, %v1210_v0 }
  0x32   : > { %263 = vst.msk [vmem:[#allocation2 + $0x40] sm:$0x3] %vm256_vm1, %v1210_v0 }
  0x33   : > { %266 = vst.msk [vmem:[#allocation2 + $0x58] sm:$0x3] %vm256_vm1, %v1210_v0 }
  0x34   : > { %269 = vst.msk [vmem:[#allocation2 + $0x70] sm:$0x3] %vm256_vm1, %v1210_v0 }
  0x35   : > { %272 = vst.msk [vmem:[#allocation2 + $0x88] sm:$0x3] %vm256_vm1, %v1210_v0 }
  0x36   : > { %275 = vst.msk [vmem:[#allocation2 + $0xa0] sm:$0x3] %vm256_vm1, %v1210_v0 }
  0x37   : > { %278 = vst.msk [vmem:[#allocation2 + $0xb8] sm:$0x3] %vm256_vm1, %v1210_v0 }
  0x38   : > { %281 = vst.msk [vmem:[#allocation2 + $0xd0] sm:$0x3] %vm256_vm1, %v1210_v0 }
  0x39   : > { %284 = vst.msk [vmem:[#allocation2 + $0xe8] sm:$0x3] %vm256_vm1, %v1210_v0 }
  0x3a   : > { %287 = vst.msk [vmem:[#allocation2 + $0x100] sm:$0x3] %vm256_vm1, %v1210_v0 }
  0x3b   : > { %290 = vst.msk [vmem:[#allocation2 + $0x118] sm:$0x3] %vm256_vm1, %v1210_v0 }
  0x3c   : > { %293 = vst.msk [vmem:[#allocation2 + $0x130] sm:$0x3] %vm256_vm1, %v1210_v0 }
  0x3d   : > { %296 = vst.msk [vmem:[#allocation2 + $0x148] sm:$0x3] %vm256_vm1, %v1210_v0 }
  0x3e   : > { %299 = vst.msk [vmem:[#allocation2 + $0x160] sm:$0x3] %vm256_vm1, %v1210_v0 }
  0x3f   : > { %302 = vst.msk [vmem:[#allocation2 + $0x178] sm:$0x3] %vm256_vm1, %v1210_v0 }
  0x40   : > { %305 = vst.msk [vmem:[#allocation2 + $0x190] sm:$0x3] %vm256_vm1, %v1210_v0 }
  0x41   : > { %308 = vst.msk [vmem:[#allocation2 + $0x1a8] sm:$0x3] %vm256_vm1, %v1210_v0 }
  0x42   : > { %342 = vst.msk [vmem:[#allocation2 + $0x19] sm:$0xff] %vm253_vm0, %v309_v3 }
  0x43   : > { %343 = vst.msk [vmem:[#allocation2 + $0x21] sm:$0xff] %vm253_vm0, %v310_v4 }
  0x44   : > { %344 = vst.msk [vmem:[#allocation2 + $0x31] sm:$0xff] %vm253_vm0, %v311_v5 }
  0x45   : > { %345 = vst.msk [vmem:[#allocation2 + $0x39] sm:$0xff] %vm253_vm0, %v312_v6 }
  0x46   : > { %346 = vst.msk [vmem:[#allocation2 + $0x49] sm:$0xff] %vm253_vm0, %v313_v7 }
  0x47   : > { %347 = vst.msk [vmem:[#allocation2 + $0x51] sm:$0xff] %vm253_vm0, %v314_v8 }
  0x48   : > { %348 = vst.msk [vmem:[#allocation2 + $0x61] sm:$0xff] %vm253_vm0, %v315_v9 }
  0x49   : > { %349 = vst.msk [vmem:[#allocation2 + $0x69] sm:$0xff] %vm253_vm0, %v316_v10 }
  0x4a   : > { %350 = vst.msk [vmem:[#allocation2 + $0x79] sm:$0xff] %vm253_vm0, %v317_v11 }
  0x4b   : > { %351 = vst.msk [vmem:[#allocation2 + $0x81] sm:$0xff] %vm253_vm0, %v318_v12 }
  0x4c   : > { %352 = vst.msk [vmem:[#allocation2 + $0x91] sm:$0xff] %vm253_vm0, %v319_v13 }
  0x4d   : > { %353 = vst.msk [vmem:[#allocation2 + $0x99] sm:$0xff] %vm253_vm0, %v320_v14 }
  0x4e   : > { %354 = vst.msk [vmem:[#allocation2 + $0xa9] sm:$0xff] %vm253_vm0, %v321_v15 }
  0x4f   : > { %355 = vst.msk [vmem:[#allocation2 + $0xb1] sm:$0xff] %vm253_vm0, %v322_v16 }
  0x50   : > { %356 = vst.msk [vmem:[#allocation2 + $0xc1] sm:$0xff] %vm253_vm0, %v323_v17 }
  0x51   : > { %357 = vst.msk [vmem:[#allocation2 + $0xc9] sm:$0xff] %vm253_vm0, %v324_v18 }
  0x52   : > { %358 = vst.msk [vmem:[#allocation2 + $0xd9] sm:$0xff] %vm253_vm0, %v325_v19 }
  0x53   : > { %359 = vst.msk [vmem:[#allocation2 + $0xe1] sm:$0xff] %vm253_vm0, %v326_v20 }
  0x54   : > { %360 = vst.msk [vmem:[#allocation2 + $0xf1] sm:$0xff] %vm253_vm0, %v327_v21 }
  0x55   : > { %361 = vst.msk [vmem:[#allocation2 + $0xf9] sm:$0xff] %vm253_vm0, %v328_v22 }
  0x56   : > { %362 = vst.msk [vmem:[#allocation2 + $0x109] sm:$0xff] %vm253_vm0, %v329_v23 }
  0x57   : > { %363 = vst.msk [vmem:[#allocation2 + $0x111] sm:$0xff] %vm253_vm0, %v330_v24 }
  0x58   : > { %364 = vst.msk [vmem:[#allocation2 + $0x121] sm:$0xff] %vm253_vm0, %v331_v25 }
  0x59   : > { %365 = vst.msk [vmem:[#allocation2 + $0x129] sm:$0xff] %vm253_vm0, %v332_v26 }
  0x5a   : > { %366 = vst.msk [vmem:[#allocation2 + $0x139] sm:$0xff] %vm253_vm0, %v333_v27 }
  0x5b   : > { %367 = vst.msk [vmem:[#allocation2 + $0x141] sm:$0xff] %vm253_vm0, %v334_v28 }
  0x5c   : > { %368 = vst.msk [vmem:[#allocation2 + $0x151] sm:$0xff] %vm253_vm0, %v335_v29 }
  0x5d   : > { %369 = vst.msk [vmem:[#allocation2 + $0x159] sm:$0xff] %vm253_vm0, %v336_v30 }
  0x5e   : > { %370 = vst.msk [vmem:[#allocation2 + $0x169] sm:$0xff] %vm253_vm0, %v337_v31 }
  0x5f   : > { %371 = vst.msk [vmem:[#allocation2 + $0x171] sm:$0xff] %vm253_vm0, %v338_v32 }
  0x60   : > { %372 = vst.msk [vmem:[#allocation2 + $0x181] sm:$0xff] %vm253_vm0, %v339_v33 }
  0x61   : > { %373 = vst.msk [vmem:[#allocation2 + $0x189] sm:$0xff] %vm253_vm0, %v340_v34 }
  0x62   : > { %375 = vst.msk [vmem:[#allocation3] sm:$0xf] %vm374_vm2, %v1211_v35 }
  0x63   : > { %378 = vst.msk [vmem:[#allocation3 + $0x8] sm:$0xf] %vm374_vm2, %v1211_v35 }
  0x64   : > { %380 = vst.msk [vmem:[#allocation3 + $0x10] sm:$0xf] %vm374_vm2, %v1211_v35 }
  0x65   : > { %382 = vst.msk [vmem:[#allocation3 + $0x18] sm:$0xf] %vm374_vm2, %v1211_v35 }
  0x66   : > { %384 = vst.msk [vmem:[#allocation3 + $0x20] sm:$0xf] %vm374_vm2, %v1211_v35 }
  0x67   : > { %386 = vst.msk [vmem:[#allocation3 + $0x28] sm:$0xf] %vm374_vm2, %v1211_v35 }
  0x68   : > { %388 = vst.msk [vmem:[#allocation3 + $0x30] sm:$0xf] %vm374_vm2, %v1211_v35 }
  0x69   : > { %390 = vst.msk [vmem:[#allocation3 + $0x38] sm:$0xf] %vm374_vm2, %v1211_v35 }
  0x6a   : > { %392 = vst.msk [vmem:[#allocation3 + $0x40] sm:$0xf] %vm374_vm2, %v1211_v35 }
  0x6b   : > { %394 = vst.msk [vmem:[#allocation3 + $0x48] sm:$0xf] %vm374_vm2, %v1211_v35 }
  0x6c   : > { %377 = vst.msk [vmem:[#allocation3 + $0x4] sm:$0x1] %vm376_vm3, %v1211_v35 }
  0x6d   : > { %379 = vst.msk [vmem:[#allocation3 + $0xc] sm:$0x1] %vm376_vm3, %v1211_v35 }
  0x6e   : > { %381 = vst.msk [vmem:[#allocation3 + $0x14] sm:$0x1] %vm376_vm3, %v1211_v35 }
  0x6f   : > { %383 = vst.msk [vmem:[#allocation3 + $0x1c] sm:$0x1] %vm376_vm3, %v1211_v35 }
  0x70   : > { %385 = vst.msk [vmem:[#allocation3 + $0x24] sm:$0x1] %vm376_vm3, %v1211_v35 }
  0x71   : > { %387 = vst.msk [vmem:[#allocation3 + $0x2c] sm:$0x1] %vm376_vm3, %v1211_v35 }
  0x72   : > { %389 = vst.msk [vmem:[#allocation3 + $0x34] sm:$0x1] %vm376_vm3, %v1211_v35 }
  0x73   : > { %391 = vst.msk [vmem:[#allocation3 + $0x3c] sm:$0x1] %vm376_vm3, %v1211_v35 }
  0x74   : > { %393 = vst.msk [vmem:[#allocation3 + $0x44] sm:$0x1] %vm376_vm3, %v1211_v35 }
  0x75   : > { %395 = vst.msk [vmem:[#allocation3 + $0x4c] sm:$0x1] %vm376_vm3, %v1211_v35 }
  0x76 LB: >> { %v415_v36 = vld [vmem:[%s1625_s1] sm:$0x3]  ;;  %vm419_vm4 = vcmask 1041408   ;;  %v1090_v37 = vld [vmem:[%s1625_s1 + $0x4] sm:$0x3]  ;;  %s1084_s20 = smul.u32 48, %s1204_s11  ;;  %s1204_s11 = sphi %s1471_s11, %s409_s11  }
  0x77   : >> { %v421_v38 = vsel %vm419_vm4, %v415_v36, 0  ;;  %v471_v39 = vsel %vm419_vm4, %v1090_v37, 0  ;;  %v1095_v40 = vld [vmem:[%s1625_s1 + $0x6] sm:$0x3]  ;;  %v1087_v41 = vld [vmem:[%s1625_s1 + $0x2] sm:$0x3] }
  0x78   : >> { %430 = vmatpush.bf16.msra.mxu0 %v421_v38  ;;  %480 = vmatpush.bf16.msra.mxu2 %v471_v39  ;;  %v498_v42 = vsel %vm419_vm4, %v1095_v40, 0  ;;  %v446_v43 = vsel %vm419_vm4, %v1087_v41, 0  ;;  %v1098_v44 = vld [vmem:[%s1625_s1 + $0x8] sm:$0x3]  ;;  %v1106_v46 = vld [vmem:[%s1625_s1 + $0xc] sm:$0x3] }
  0x79   : >> { %507 = vmatpush.bf16.msra.mxu3 %v498_v42  ;;  %455 = vmatpush.bf16.msra.mxu1 %v446_v43  ;;  %v523_v45 = vsel %vm419_vm4, %v1098_v44, 0  ;;  %v1109_v47 = vld [vmem:[%s1625_s1 + $0xe] sm:$0x3]  ;;  %v575_v48 = vsel %vm419_vm4, %v1106_v46, 0  ;;  %v1101_v50 = vld [vmem:[%s1625_s1 + $0xa] sm:$0x3] }
  0x7a   : >> { %v600_v49 = vsel %vm419_vm4, %v1109_v47, 0  ;;  %s1508_s7 = scalar_lea.vmem [#allocation2], %s1084_s20  ;;  %v548_v58 = vsel %vm419_vm4, %v1101_v50, 0  ;;  %v1112_v60 = vld [vmem:[%s1625_s1 + $0x10] sm:$0x3]  ;;  %s1114_s10 = sshll.u32 %s1204_s11, 3 }
  0x7b   : >> { %v413_v51 = vld [vmem:[%s1508_s7] ss:$2 sm:$0xff]  ;;  %v1086_v57 = vld [vmem:[%s1508_s7 + $0x1] ss:$2 sm:$0xff]  ;;  %v625_v61 = vsel %vm419_vm4, %v1112_v60, 0  ;;  %s1023_s12 = scalar_lea.vmem [#allocation3], %s1114_s10 }
  0x7c   : >> { %532 = vmatpush.bf16.msrb.mxu0 %v523_v45  ;;  %v1089_v52 = vld [vmem:[%s1508_s7 + $0x2] ss:$2 sm:$0xff]  ;;  %584 = vmatpush.bf16.msrb.mxu2 %v575_v48  ;;  %v414_v54 = vpack.c.bf16 %v413_v51, %v413_v51  ;;  %v439_v59 = vpack.c.bf16 %v1086_v57, %v1086_v57  ;;  %v1097_v62 = vld [vmem:[%s1508_s7 + $0x19] ss:$2 sm:$0xff]  ;;  %v1111_v8 = vld [vmem:[%s1508_s7 + $0x32] ss:$2 sm:$0xff] }
  0x7d   : >> { %v1094_v53 = vld [vmem:[%s1508_s7 + $0x18] ss:$2 sm:$0xff]  ;;  %609 = vmatpush.bf16.msrb.mxu3 %v600_v49  ;;  %v464_v55 = vpack.c.bf16 %v1089_v52, %v1089_v52  ;;  %557 = vmatpush.bf16.msrb.mxu1 %v548_v58  ;;  %v1108_v0 = vld [vmem:[%s1508_s7 + $0x31] ss:$2 sm:$0xff]  ;;  %v516_v4 = vpack.c.bf16 %v1097_v62, %v1097_v62  ;;  %v618_v9 = vpack.c.bf16 %v1111_v8, %v1111_v8  ;;  %vm658_vm5 = vsmask.f32 7938 }
  0x7e   : >> { %v491_v56 = vpack.c.bf16 %v1094_v53, %v1094_v53  ;;  %1085 = vmatmul.msk.bf16.vlgmr.msra.gmra.mxu0 %vm253_vm0, %v414_v54  ;;  %1088 = vmatmul.msk.bf16.vlgmr.msra.gmra.mxu1 %vm253_vm0, %v439_v59  ;;  %v1105_v63 = vld [vmem:[%s1508_s7 + $0x30] ss:$2 sm:$0xff]  ;;  %v593_v6 = vpack.c.bf16 %v1108_v0, %v1108_v0  ;;  %vm664_vm6 = vsmask.f32 256  ;;  %vm659_vm7 = vmand %vm374_vm2, %vm658_vm5  ;;  %v1115_v42 = vld [vmem:[%s1023_s12 + $0x8] sm:$0xf] }
  0x7f   : >> { %1091 = vmatmul.msk.bf16.vlgmr.msra.gmra.mxu2 %vm253_vm0, %v464_v55  ;;  %v1100_v3 = vld [vmem:[%s1508_s7 + $0x1a] ss:$2 sm:$0xff]  ;;  %v568_v5 = vpack.c.bf16 %v1105_v63, %v1105_v63  ;;  %vm665_vm8 = vmand %vm376_vm3, %vm664_vm6  ;;  %v1117_v43 = vld [vmem:[%s1023_s12 + $0xc] sm:$0x1]  ;;  %s409_s11 = sadd.s32 1, %s1204_s11  }
  0x80   : >> { %1096 = vmatmul.msk.bf16.vlgmr.msra.gmra.mxu3 %vm253_vm0, %v491_v56  ;;  %634 = vmatpush.bf16.msra.mxu0 %v625_v61  ;;  %v541_v7 = vpack.c.bf16 %v1100_v3, %v1100_v3  ;;  %p406_p4 = scmp.ge.s32.totalorder %s409_s11, 8  }
  0x81   : > { %s1540_s13 = smov (%p406_p4), 0  }
  0x8e   : >> { %1099 = vmatmul.msk.bf16.vlgmr.msrb.gmra.mxu0 %vm253_vm0, %v516_v4  ;;  %1102 = vmatmul.msk.bf16.vlgmr.msrb.gmra.mxu1 %vm253_vm0, %v541_v7 }
  0x8f   : >> { %1107 = vmatmul.msk.bf16.vlgmr.msrb.gmra.mxu2 %vm253_vm0, %v568_v5 }
  0x90   : >> { %1110 = vmatmul.msk.bf16.vlgmr.msrb.gmra.mxu3 %vm253_vm0, %v593_v6 }
  0x9e   : >> { %1113 = vmatmul.msk.bf16.vlgmr.msra.gmra.mxu0 %vm253_vm0, %v618_v9 }
  0xfb   : >> { %v432_v10 = vpop.f32.mrf.mxu0  ;;  %v457_v11 = vpop.f32.mrf.mxu1 }
  0xfc   : >> { %v436_v15 = vadd.f32 %v1268_v1, %v432_v10 }
  0xfe   : >> { %v461_v17 = vadd.f32 %v457_v11, %v436_v15 }
 0x102   : >> { %v482_v12 = vpop.f32.mrf.mxu2 }
 0x103   : >> { %v509_v13 = vpop.f32.mrf.mxu3  ;;  %v434_v14 = vpop.f32.mrf.mxu0  ;;  %v486_v19 = vadd.f32 %v482_v12, %v461_v17 }
 0x104   : >> { %v459_v16 = vpop.f32.mrf.mxu1 }
 0x105   : >> { %v513_v23 = vadd.f32 %v509_v13, %v486_v19 }
 0x10a   : >> { %v484_v18 = vpop.f32.mrf.mxu2 }
 0x10b   : >> { %v511_v20 = vpop.f32.mrf.mxu3  ;;  %v534_v21 = vpop.f32.mrf.mxu0 }
 0x10c   : >> { %v559_v22 = vpop.f32.mrf.mxu1  ;;  %v538_v24 = vadd.f32 %v534_v21, %v513_v23 }
 0x10e   : >> { %v563_v28 = vadd.f32 %v559_v22, %v538_v24 }
 0x112   : >> { %v586_v25 = vpop.f32.mrf.mxu2 }
 0x113   : >> { %v611_v26 = vpop.f32.mrf.mxu3  ;;  %v536_v27 = vpop.f32.mrf.mxu0  ;;  %v590_v30 = vadd.f32 %v586_v25, %v563_v28 }
 0x114   : >> { %v561_v29 = vpop.f32.mrf.mxu1 }
 0x115   : >> { %v615_v32 = vadd.f32 %v611_v26, %v590_v30 }
 0x11a   : >> { %v588_v31 = vpop.f32.mrf.mxu2 }
 0x11b   : >> { %v613_v33 = vpop.f32.mrf.mxu3  ;;  %v636_v34 = vpop.f32.mrf.mxu0 }
 0x11c   : >> { %v640_v35 = vadd.f32 %v636_v34, %v615_v32 }
 0x11e   : >> { %v641_v36 = vmax.f32 %v640_v35, 0.0 }
 0x120   : >> { %v642_v37 = vpack.c.bf16 %v641_v36, %v641_v36 }
 0x122   : >> { %v645_v38 = vshrl.u32 %v642_v37, 16  ;;  %v648_v41 = vshll.u32 %v642_v37, 16 }
 0x123   : >> { %v638_v39 = vpop.f32.mrf.mxu0 }
 0x124   : >> { %v647_v40 = vrot.slane %v645_v38, 7 }
 0x126   : >> { %v650_v44 = vor.u32 %v648_v41, %v647_v40  ;;  %v651_v45 = vrot.slane %v647_v40, 4  ;;  %408 = sbr.rel (!%p406_p4) target bundleno = 118 (0x76), region = 121 }
 0x128   : >> { %v661_v46 = vsel %vm659_vm7, %v650_v44, %v1115_v42  ;;  %v667_v47 = vsel %vm665_vm8, %v651_v45, %v1117_v43 }
 0x129   : >> { %1116 = vst [vmem:[%s1023_s12 + $0x8] sm:$0xf] %v661_v46 }
 0x12a   : >> { %1118 = vst [vmem:[%s1023_s12 + $0xc] sm:$0x1] %v667_v47 }
 0x12b LB: >> { %v679_v48 = vld [vmem:[%s1627_s3] sm:$0xf]  ;;  %vm684_vm9 = vcmask 1043456   ;;  %v1124_v49 = vld [vmem:[%s1627_s3 + $0x8] sm:$0xf]  ;;  %s1157_s22 = sshll.u32 %s1208_s13, 3  ;;  %s1208_s13 = sphi %s1540_s13, %s674_s13  }
 0x12c   : >> { %v686_v50 = vsel %vm684_vm9, %v679_v48, 0  ;;  %v749_v1 = vsel %vm684_vm9, %v1124_v49, 0  ;;  %v1128_v51 = vld [vmem:[%s1627_s3 + $0xc] sm:$0xf]  ;;  %v1122_v52 = vld [vmem:[%s1627_s3 + $0x4] sm:$0xf]  ;;  %s975_s17 = scalar_lea.vmem %s1283_s30, %s1157_s22 }
 0x12d   : >> { %695 = vmatpush.bf16.msra.mxu0 %v686_v50  ;;  %vm680_vm10 = vcmask 64512   ;;  %758 = vmatpush.bf16.msra.mxu2 %v749_v1  ;;  %v776_v53 = vsel %vm684_vm9, %v1128_v51, 0  ;;  %v722_v54 = vsel %vm684_vm9, %v1122_v52, 0  ;;  %v1132_v55 = vld [vmem:[%s1627_s3 + $0x10] sm:$0xf]  ;;  %s1574_s29 = scalar_lea.vmem [#allocation3], %s1157_s22 }
 0x12e   : >> { %785 = vmatpush.bf16.msra.mxu3 %v776_v53  ;;  %731 = vmatpush.bf16.msra.mxu1 %v722_v54  ;;  %v812_v56 = vsel %vm684_vm9, %v1132_v55, 0  ;;  %v1135_v57 = vld [vmem:[%s1627_s3 + $0x14] sm:$0xf]  ;;  %v1139_v58 = vld [vmem:[%s1627_s3 + $0x18] sm:$0xf]  ;;  %s1149_s15 = smul.u32 48, %s1208_s13 }
 0x12f   : >> { %v839_v4 = vsel %vm684_vm9, %v1135_v57, 0  ;;  %v866_v5 = vsel %vm684_vm9, %v1139_v58, 0  ;;  %v1143_v9 = vld [vmem:[%s1627_s3 + $0x1c] sm:$0xf]  ;;  %v1146_v18 = vld [vmem:[%s1627_s3 + $0x20] sm:$0xf] }
 0x130   : >> { %v902_v13 = vsel %vm684_vm9, %v1143_v9, 0  ;;  %v929_v24 = vsel %vm684_vm9, %v1146_v18, 0  ;;  %v951_v27 = vld [vmem:[%s1629_s5] sm:$0x3]  ;;  %s1035_s16 = scalar_lea.vmem [#allocation2], %s1149_s15  ;;  %s674_s13 = sadd.s32 1, %s1208_s13  }
 0x131   : >> { %v678_v59 = vld [vmem:[%s1574_s29] sm:$0xf]  ;;  %v703_v60 = vld [vmem:[%s1574_s29 + $0x4] sm:$0x1]  ;;  %821 = vmatpush.bf16.msrb.mxu0 %v812_v56  ;;  %v1127_v0 = vld [vmem:[%s1574_s29 + $0x8] sm:$0xf]  ;;  %875 = vmatpush.bf16.msrb.mxu2 %v866_v5 }
 0x132   : >> { %v738_v61 = vld [vmem:[%s1574_s29] sm:$0xe]  ;;  %1121 = vmatmul.msk.bf16.vlgmr.msra.gmra.mxu0 %vm680_vm10, %v678_v59  ;;  %v709_v62 = vunpack.c.l.b16 %v703_v60  ;;  %1129 = vmatmul.msk.bf16.vlgmr.msra.gmra.mxu3 %vm680_vm10, %v1127_v0  ;;  %v1130_v7 = vld [vmem:[%s1574_s29 + $0x8] sm:$0xf]  ;;  %v1131_v8 = vld [vmem:[%s1574_s29 + $0xc] sm:$0x1] }
 0x133   : >> { %v742_v63 = vunpack.c.l.b16 %v738_v61  ;;  %v702_v3 = vld [vmem:[%s1574_s29] sm:$0xf]  ;;  %848 = vmatpush.bf16.msrb.mxu1 %v839_v4  ;;  %v798_v11 = vunpack.c.l.b16 %v1130_v7  ;;  %v799_v12 = vunpack.c.l.b16 %v1131_v8  ;;  %v1141_v14 = vld [vmem:[%s1574_s29 + $0x10] sm:$0xf]  ;;  %911 = vmatpush.bf16.msrb.mxu3 %v902_v13  ;;  %v1142_v16 = vld [vmem:[%s1574_s29 + $0x14] sm:$0x1] }
 0x134   : >> { %v708_v6 = vunpack.c.l.b16 %v702_v3  ;;  %v888_v17 = vunpack.c.l.b16 %v1141_v14  ;;  %v889_v21 = vunpack.c.l.b16 %v1142_v16  ;;  %v957_v34 = vsel %vm419_vm4, %v951_v27, 0  ;;  %v1134_v37 = vld [vmem:[%s1574_s29 + $0x8] sm:$0xe]  ;;  %v1145_v40 = vld [vmem:[%s1574_s29 + $0x10] sm:$0xe]  ;;  %p671_p5 = scmp.ge.s32.totalorder %s674_s13, 8  }
 0x135   : >> { %v743_v10 = vpack.c.b16 %v709_v62, %v742_v63  ;;  %v800_v20 = vpack.c.b16 %v799_v12, %v798_v11  ;;  %938 = vmatpush.bf16.msra.mxu0 %v929_v24  ;;  %v832_v39 = vunpack.c.l.b16 %v1134_v37  ;;  %v1138_v41 = vld [vmem:[%s1574_s29 + $0x10] sm:$0xf]  ;;  %v922_v43 = vunpack.c.l.b16 %v1145_v40  ;;  %v1150_v47 = vld [vmem:[%s1035_s16 + $0x19] ss:$2 sm:$0xff] }
 0x136   : >> { %v710_v15 = vpack.c.b16 %v709_v62, %v708_v6  ;;  %v890_v26 = vpack.c.b16 %v889_v21, %v888_v17  ;;  %v950_v48 = vpack.c.bf16 %v1150_v47, %v1150_v47 }
 0x137   : >> { %v744_v19 = vrot.slane %v743_v10, 1  ;;  %v804_v25 = vshll.u32 %v800_v20, 16  ;;  %v802_v29 = vshrl.u32 %v800_v20, 16  ;;  %v833_v42 = vpack.c.b16 %v799_v12, %v832_v39 }
 0x138   : >> { %v712_v22 = vshrl.u32 %v710_v15, 16  ;;  %v714_v23 = vshll.u32 %v710_v15, 16  ;;  %v894_v31 = vshll.u32 %v890_v26, 16  ;;  %v892_v33 = vshrl.u32 %v890_v26, 16 }
 0x139   : >> { %1125 = vmatmul.msk.bf16.vlgmr.msra.gmra.mxu2 %vm680_vm10, %v744_v19  ;;  %v806_v30 = vrot.slane %v804_v25, 1  ;;  %v834_v44 = vrot.slane %v833_v42, 1  ;;  %v923_v45 = vpack.c.b16 %v889_v21, %v922_v43 }
 0x13a   : >> { %v716_v28 = vrot.slane %v714_v23, 1  ;;  %v896_v35 = vrot.slane %v894_v31, 1 }
 0x13b   : >> { %v807_v36 = vor.u32 %v806_v30, %v802_v29  ;;  %v924_v46 = vrot.slane %v923_v45, 1 }
 0x13c   : >> { %v717_v32 = vor.u32 %v716_v28, %v712_v22  ;;  %v897_v38 = vor.u32 %v896_v35, %v892_v33 }
 0x13e   : >> { %1123 = vmatmul.msk.bf16.vlgmr.msra.gmra.mxu1 %vm680_vm10, %v717_v32 }
 0x13f   : >> { %966 = vmatpush.bf16.msra.mxu1 %v957_v34 }
 0x142   : >> { %1133 = vmatmul.msk.bf16.vlgmr.msrb.gmra.mxu0 %vm680_vm10, %v807_v36  ;;  %1144 = vmatmul.msk.bf16.vlgmr.msrb.gmra.mxu3 %vm680_vm10, %v897_v38 }
 0x149   : >> { %1140 = vmatmul.msk.bf16.vlgmr.msrb.gmra.mxu2 %vm680_vm10, %v1138_v41 }
 0x14e   : >> { %1136 = vmatmul.msk.bf16.vlgmr.msrb.gmra.mxu1 %vm680_vm10, %v834_v44 }
 0x152   : >> { %1147 = vmatmul.msk.bf16.vlgmr.msra.gmra.mxu0 %vm680_vm10, %v924_v46 }
 0x15e   : >> { %1151 = vmatmul.msk.bf16.vlgmr.msra.gmra.mxu1 %vm253_vm0, %v950_v48 }
 0x1af   : >> { %v697_v49 = vpop.f32.mrf.mxu0 }
 0x1b0   : >> { %v701_v52 = vadd.f32 %v1273_v2, %v697_v49 }
 0x1b5   : >> { %v787_v50 = vpop.f32.mrf.mxu3 }
 0x1b7   : >> { %v699_v1 = vpop.f32.mrf.mxu0 }
 0x1bb   : >> { %v733_v51 = vpop.f32.mrf.mxu1 }
 0x1bc   : >> { %v760_v53 = vpop.f32.mrf.mxu2  ;;  %v737_v55 = vadd.f32 %v733_v51, %v701_v52 }
 0x1bd   : >> { %v789_v54 = vpop.f32.mrf.mxu3 }
 0x1be   : >> { %v764_v58 = vadd.f32 %v760_v53, %v737_v55 }
 0x1bf   : >> { %v823_v56 = vpop.f32.mrf.mxu0 }
 0x1c0   : >> { %v791_v61 = vadd.f32 %v787_v50, %v764_v58 }
 0x1c2   : >> { %v827_v0 = vadd.f32 %v823_v56, %v791_v61 }
 0x1c3   : >> { %v735_v57 = vpop.f32.mrf.mxu1 }
 0x1c4   : >> { %v762_v59 = vpop.f32.mrf.mxu2 }
 0x1c5   : >> { %v913_v60 = vpop.f32.mrf.mxu3 }
 0x1c7   : >> { %v825_v62 = vpop.f32.mrf.mxu0 }
 0x1cb   : >> { %v850_v63 = vpop.f32.mrf.mxu1 }
 0x1cc   : >> { %v877_v3 = vpop.f32.mrf.mxu2  ;;  %v854_v4 = vadd.f32 %v850_v63, %v827_v0 }
 0x1cd   : >> { %v915_v5 = vpop.f32.mrf.mxu3 }
 0x1ce   : >> { %v881_v7 = vadd.f32 %v877_v3, %v854_v4 }
 0x1cf   : >> { %v940_v6 = vpop.f32.mrf.mxu0 }
 0x1d0   : >> { %v917_v10 = vadd.f32 %v913_v60, %v881_v7 }
 0x1d2   : >> { %v944_v12 = vadd.f32 %v940_v6, %v917_v10 }
 0x1d3   : >> { %v852_v8 = vpop.f32.mrf.mxu1 }
 0x1d4   : >> { %v879_v9 = vpop.f32.mrf.mxu2 }
 0x1d7   : >> { %v942_v11 = vpop.f32.mrf.mxu0 }
 0x1db   : >> { %v968_v13 = vpop.f32.mrf.mxu1 }
 0x1dc   : >> { %v972_v14 = vadd.f32 %v968_v13, %v944_v12 }
 0x1de   : >> { %v973_v15 = vmax.f32 %v972_v14, 0.0 }
 0x1df   : > { %673 = sbr.rel (!%p671_p5) target bundleno = 299 (0x12b), region = 132 }
 0x1e0   : >> { %976 = vst.msk [vmem:[%s975_s17] sm:$0xff] %vm680_vm10, %v973_v15 }
 0x1e3   : >> { %v970_v16 = vpop.f32.mrf.mxu1 }
 0x1e4 PF: > { %s16_s21 = sadd.s32 1, %s1200_s21  }
 0x1e5   : > { %p13_p6 = scmp.ge.s32.totalorder %s16_s21, 4  }
 0x1e7   :  { %15 = sbr.rel (!%p13_p6) target bundleno = 1 (0x1), region = 143 }

</bundles_post_ra>
